<compile_context>
chip_gen: v6e
topology: v6e:2x2x1
jax: 0.10.0
libtpu: 0.0.40
codegen_flags: <defaults>
</compile_context>

<pallas_src>
import functools
import math

import jax
import jax.numpy as jnp
from jax.experimental import pallas as pl
from jax.experimental.pallas import tpu as pltpu


_BLOCK_BUDGET_BYTES = 4 * 1024 * 1024    # per pipelined buffer (2-8 MiB sweet spot)
_VMEM_LIMIT_BYTES = 32 * 1024 * 1024     # safe on v5e/v6e/v7x; lifts v5e's 16 MiB default
_MAX_STATS_COLS = 8192                   # bounds the unrolled lane fold (<=64 groups)


def _round_up(x, m):
    return ((x + m - 1) // m) * m


def _largest_divisor_leq(n, cap):
    cap = max(1, min(cap, n))
    for d in range(cap, 0, -1):
        if n % d == 0:
            return d
    return 1


def _pick_stats_cols(hw, c_pad, itemsize, budget, max_cols=_MAX_STATS_COLS):
    """hw-tile width for the stats pass: full HW, an exact 128-multiple divisor,
    or (rare) a non-dividing 128-multiple with in-kernel masking of the ragged
    last block."""
    cap = min(max_cols, budget // (c_pad * itemsize))
    cap = max(128, (cap // 128) * 128)
    if hw <= cap:
        return hw                       # full extent: always a legal block dim
    best = 0
    t = cap
    while t >= 128:
        if hw % t == 0:
            best = t
            break
        t -= 128
    if best >= min(cap, 1024):
        return best                     # wide exact divisor: no masking needed
    return cap                          # ragged last block; masked in-kernel


# --------------------------------------------------------------------------
# Phase 1: per-channel partial sums over the reference samples.
# --------------------------------------------------------------------------
def _stats_partial_kernel(x_ref, sum_ref, sq_ref, *, hw, hw_t, lane_w, mask_ragged):
    h = pl.program_id(1)

    @pl.when(h == 0)
    def _init():
        sum_ref[...] = jnp.zeros_like(sum_ref)
        sq_ref[...] = jnp.zeros_like(sq_ref)

    xb = x_ref[...].astype(jnp.float32)                   # (Nb, C, hw_t)
    if mask_ragged:
        # Only compiled in when hw_t does not divide HW: zero the padded columns
        # of the (runtime) last hw block.  Trivially true elsewhere.
        col = jax.lax.broadcasted_iota(jnp.int32, xb.shape, dimension=2)
        xb = jnp.where(h * hw_t + col < hw, xb, jnp.float32(0.0))

    xs = jnp.sum(xb, axis=0)                              # (C, hw_t)  VPU vreg adds
    qs = jnp.sum(xb * xb, axis=0)                         # (C, hw_t)

    if lane_w == 128:
        # Fold lane groups with 128-aligned static slices (VPU only, no XLU tree).
        groups = hw_t // 128
        ps = xs[:, 0:128]
        pq = qs[:, 0:128]
        for g in range(1, groups):
            ps = ps + xs[:, g * 128:(g + 1) * 128]
            pq = pq + qs[:, g * 128:(g + 1) * 128]
    else:
        # hw_t == HW and HW is not a multiple of 128: single cross-lane reduce.
        ps = jnp.sum(xs, axis=-1, keepdims=True)
        pq = jnp.sum(qs, axis=-1, keepdims=True)

    sum_ref[...] += ps[None, :, :]
    sq_ref[...] += pq[None, :, :]


# --------------------------------------------------------------------------
# Phase 2: y = x * scale + shift on the (N*C, HW) row view.
# --------------------------------------------------------------------------
def _normalize_kernel(x_ref, scale_ref, shift_ref, o_ref):
    x = x_ref[...].astype(jnp.float32)                    # (Rb, bc)
    y = x * scale_ref[...] + shift_ref[...]               # (Rb, 1) broadcast over lanes
    o_ref[...] = y.astype(o_ref.dtype)


def ref_batchnorm_forward(x_nchw, weight, bias, *, ref_batch_size=256, eps=1e-5):
    """Training-mode forward of _RefBatchNorm on an NCHW input.

    Returns (y, batch_mean, batch_var); the caller copies mean/var into the
    running buffers (torch does this in-place).
    """
    N, C, H, W = x_nchw.shape
    HW = H * W
    NC = N * C
    itemsize = jnp.dtype(x_nchw.dtype).itemsize

    n_ref = min(ref_batch_size, N)
    n_start = N - n_ref                       # reference samples = input[-n_ref:]
    count = n_ref * HW
    var_denom = max(count - 1, 1)             # TODO(synk): torch emits inf/nan at count==1

    # ---------------- Phase 1: partial sums ----------------
    c_pad = _round_up(C, 8)                   # sublane-padded channel count (VMEM estimate)
    hw_t = _pick_stats_cols(HW, c_pad, itemsize, _BLOCK_BUDGET_BYTES)
    hw_t = min(hw_t, HW)
    hw_blocks = pl.cdiv(HW, hw_t)
    mask_ragged = (HW % hw_t) != 0
    lane_w = 128 if (hw_t % 128) == 0 else 1

    # Nb must divide n_ref and n_start so block indices along N stay aligned.
    g = n_ref if n_start == 0 else math.gcd(n_ref, n_start)
    per_sample_bytes = c_pad * _round_up(hw_t, 128) * itemsize
    nb = _largest_divisor_leq(g, max(1, _BLOCK_BUDGET_BYTES // per_sample_bytes))
    n_blocks = n_ref // nb
    n0_blk = n_start // nb                    # block offset of the first reference sample

    x3 = x_nchw.reshape(N, C, HW)             # free contiguous reshape

    stats_kernel = functools.partial(
        _stats_partial_kernel, hw=HW, hw_t=hw_t, lane_w=lane_w,
        mask_ragged=mask_ragged)

    part_shape = jax.ShapeDtypeStruct((n_blocks, C, lane_w), jnp.float32)
    stats_bytes = n_ref * C * HW * itemsize + 2 * n_blocks * C * lane_w * 4
    psum, psq = pl.pallas_call(
        stats_kernel,
        out_shape=(part_shape, part_shape),
        grid=(n_blocks, hw_blocks),
        in_specs=[pl.BlockSpec((nb, C, hw_t), lambda n, h: (n0_blk + n, 0, h))],
        out_specs=(pl.BlockSpec((1, C, lane_w), lambda n, h: (n, 0, 0)),
                   pl.BlockSpec((1, C, lane_w), lambda n, h: (n, 0, 0))),
        compiler_params=pltpu.CompilerParams(
            dimension_semantics=("parallel", "arbitrary"),
            vmem_limit_bytes=_VMEM_LIMIT_BYTES),
        cost_estimate=pl.CostEstimate(
            flops=3 * n_ref * C * HW, transcendentals=0,
            bytes_accessed=stats_bytes),
    )(x3)

    # ---------------- Finalize (C,)-sized stats in plain JAX ----------------
    s = jnp.sum(psum, axis=(0, 2))
    q = jnp.sum(psq, axis=(0, 2))
    cnt = jnp.float32(count)
    mean = s / cnt
    # One-pass unbiased variance (matches torch Tensor.var() used both for
    # normalization and for the running_var update).  Clamp guards tiny
    # negative values from f32 cancellation at very large reference counts.
    var = (q - cnt * mean * mean) / jnp.float32(var_denom)
    var = jnp.maximum(var, jnp.float32(0.0))
    inv = jax.lax.rsqrt(var + jnp.float32(eps))
    scale = weight.astype(jnp.float32) * inv
    shift = bias.astype(jnp.float32) - mean * scale

    # ---------------- Phase 2: normalize on the 2D row view ----------------
    scale_rows = jnp.tile(scale, (N,)).reshape(NC, 1)     # tiny (N*C,) arrays
    shift_rows = jnp.tile(shift, (N,)).reshape(NC, 1)

    col_full_pad = _round_up(HW, 128)
    if 8 * col_full_pad * itemsize <= _BLOCK_BUDGET_BYTES:
        bc = HW                                           # full-row blocks
    else:
        bc = max(128, (_BLOCK_BUDGET_BYTES // (8 * itemsize)) // 128 * 128)
        bc = min(bc, (HW // 128) * 128)
    col_pad = _round_up(bc, 128)
    rmax = max(1, _BLOCK_BUDGET_BYTES // (col_pad * itemsize))
    if rmax >= NC:
        br = NC                                           # full dim: always legal
    else:
        br = max(8, (rmax // 8) * 8)

    x2 = x_nchw.reshape(NC, HW)
    norm_bytes = 2 * NC * HW * itemsize + 2 * NC * 4
    y2 = pl.pallas_call(
        _normalize_kernel,
        out_shape=jax.ShapeDtypeStruct((NC, HW), x_nchw.dtype),
        grid=(pl.cdiv(NC, br), pl.cdiv(HW, bc)),
        in_specs=[pl.BlockSpec((br, bc), lambda r, h: (r, h)),
                  pl.BlockSpec((br, 1), lambda r, h: (r, 0)),
                  pl.BlockSpec((br, 1), lambda r, h: (r, 0))],
        out_specs=pl.BlockSpec((br, bc), lambda r, h: (r, h)),
        compiler_params=pltpu.CompilerParams(
            dimension_semantics=("parallel", "parallel"),
            vmem_limit_bytes=_VMEM_LIMIT_BYTES),
        cost_estimate=pl.CostEstimate(
            flops=2 * NC * HW, transcendentals=0, bytes_accessed=norm_bytes),
    )(x2, scale_rows, shift_rows)

    y = y2.reshape(N, C, H, W)
    return y, mean, var


def _jax_reference(x_nchw, weight, bias, *, ref_batch_size=256, eps=1e-5):
    N, C, H, W = x_nchw.shape
    n_ref = min(ref_batch_size, N)
    xr = x_nchw[-n_ref:]
    xr = jnp.transpose(xr, (1, 0, 2, 3)).reshape(C, -1)
    mean = jnp.mean(xr, axis=-1)
    var = jnp.var(xr, axis=-1, ddof=1)           # torch .var() default: unbiased
    mean_b = mean.reshape(1, C, 1, 1)
    var_b = var.reshape(1, C, 1, 1)
    w = weight.reshape(1, C, 1, 1)
    b = bias.reshape(1, C, 1, 1)
    y = (x_nchw - mean_b) / jnp.sqrt(var_b + eps) * w + b
    return y, mean, var


if __name__ == "__main__":
    key = jax.random.PRNGKey(0)
    k_x, k_w = jax.random.split(key)

    N, C, H, W = 2, 4, 16, 16
    x = jax.random.normal(k_x, (N, C, H, W), dtype=jnp.float32)

    # Deterministic parameter init mirroring reset_parameters():
    #   weight ~ N(1, 0.02), bias = 0
    weight = 1.0 + 0.02 * jax.random.normal(k_w, (C,), dtype=jnp.float32)
    bias = jnp.zeros((C,), dtype=jnp.float32)

    y, run_mean, run_var = ref_batchnorm_forward(
        x, weight, bias, ref_batch_size=256, eps=1e-5)
    y = jax.block_until_ready(y)

    y_ref, mean_ref, var_ref = _jax_reference(
        x, weight, bias, ref_batch_size=256, eps=1e-5)

    assert y.shape == (N, C, H, W)
    assert jnp.allclose(y, y_ref, atol=2e-5, rtol=2e-5)
    assert jnp.allclose(run_mean, mean_ref, atol=2e-5, rtol=2e-5)
    assert jnp.allclose(run_var, var_ref, atol=2e-5, rtol=2e-5)

    # TODO(synk): eval-mode branch (normalize with the stored running buffers
    # instead of fresh batch stats) is not implemented; only the training-mode
    # forward is. The in-place buffer copy is replaced by returning mean/var.
    print("KERNEL_OK")
</pallas_src>

<mosaic_0001>
module attributes {stable_mosaic.version = 11 : i64} {
  func.func @_stats_partial_kernel(%arg0: i32, %arg1: i32, %arg2: memref<2x4x256xf32, #tpu.memory_space<vmem>>, %arg3: memref<1x4x128xf32, #tpu.memory_space<vmem>>, %arg4: memref<1x4x128xf32, #tpu.memory_space<vmem>>) attributes {dimension_semantics = [#tpu.dimension_semantics<parallel>, #tpu.dimension_semantics<arbitrary>], iteration_bounds = array<i64: 1, 1>, scalar_prefetch = 0 : i64, scratch_operands = 0 : i64, tpu.core_type = #tpu.core_type<tc>, window_params = [{transform_indices = @transform_0, window_bounds = array<i64: 2, 4, 256>}, {transform_indices = @transform_1, window_bounds = array<i64: 1, 4, 128>}, {transform_indices = @transform_2, window_bounds = array<i64: 1, 4, 128>}]} {
    %c0_i32 = arith.constant 0 : i32
    %0 = arith.cmpi eq, %arg1, %c0_i32 : i32
    %1 = arith.extui %0 : i1 to i32
    %c0_i32_0 = arith.constant 0 : i32
    %2 = arith.cmpi ne, %1, %c0_i32_0 : i32
    scf.if %2 {
      %cst_16 = arith.constant 0.000000e+00 : f32
      %21 = vector.broadcast %cst_16 : f32 to vector<1x4x128xf32>
      %c0_17 = arith.constant 0 : index
      %c0_18 = arith.constant 0 : index
      %c0_19 = arith.constant 0 : index
      %22 = vector.load %arg3[%c0_17, %c0_18, %c0_19] : memref<1x4x128xf32, #tpu.memory_space<vmem>>, vector<1x4x128xf32>
      tpu.vector_store %arg3[%c0_17, %c0_18, %c0_19], %21 {strides = array<i32>} : memref<1x4x128xf32, #tpu.memory_space<vmem>>, vector<1x4x128xf32>,
      %cst_20 = arith.constant 0.000000e+00 : f32
      %23 = vector.broadcast %cst_20 : f32 to vector<1x4x128xf32>
      %c0_21 = arith.constant 0 : index
      %c0_22 = arith.constant 0 : index
      %c0_23 = arith.constant 0 : index
      %24 = vector.load %arg4[%c0_21, %c0_22, %c0_23] : memref<1x4x128xf32, #tpu.memory_space<vmem>>, vector<1x4x128xf32>
      tpu.vector_store %arg4[%c0_21, %c0_22, %c0_23], %23 {strides = array<i32>} : memref<1x4x128xf32, #tpu.memory_space<vmem>>, vector<1x4x128xf32>,
    } else {
    }
    %c0 = arith.constant 0 : index
    %c0_1 = arith.constant 0 : index
    %c0_2 = arith.constant 0 : index
    %3 = vector.load %arg2[%c0, %c0_1, %c0_2] : memref<2x4x256xf32, #tpu.memory_space<vmem>>, vector<2x4x256xf32>
    %cst = arith.constant dense<0.000000e+00> : vector<4x256xf32>
    %4 = vector.multi_reduction <add>, %3, %cst [0] : vector<2x4x256xf32> to vector<4x256xf32>
    %5 = arith.mulf %3, %3 : vector<2x4x256xf32>
    %cst_3 = arith.constant dense<0.000000e+00> : vector<4x256xf32>
    %6 = vector.multi_reduction <add>, %5, %cst_3 [0] : vector<2x4x256xf32> to vector<4x256xf32>
    %7 = vector.extract_strided_slice %4 {offsets = [0, 0], sizes = [4, 128], strides = [1, 1]} : vector<4x256xf32> to vector<4x128xf32>
    %8 = vector.extract_strided_slice %6 {offsets = [0, 0], sizes = [4, 128], strides = [1, 1]} : vector<4x256xf32> to vector<4x128xf32>
    %9 = vector.extract_strided_slice %4 {offsets = [0, 128], sizes = [4, 128], strides = [1, 1]} : vector<4x256xf32> to vector<4x128xf32>
    %10 = arith.addf %7, %9 : vector<4x128xf32>
    %11 = vector.extract_strided_slice %6 {offsets = [0, 128], sizes = [4, 128], strides = [1, 1]} : vector<4x256xf32> to vector<4x128xf32>
    %12 = arith.addf %8, %11 : vector<4x128xf32>
    %c0_4 = arith.constant 0 : index
    %c0_5 = arith.constant 0 : index
    %c0_6 = arith.constant 0 : index
    %13 = vector.load %arg3[%c0_4, %c0_5, %c0_6] : memref<1x4x128xf32, #tpu.memory_space<vmem>>, vector<1x4x128xf32>
    %14 = vector.shape_cast %10 : vector<4x128xf32> to vector<1x4x128xf32>
    %15 = arith.addf %13, %14 : vector<1x4x128xf32>
    %c0_7 = arith.constant 0 : index
    %c0_8 = arith.constant 0 : index
    %c0_9 = arith.constant 0 : index
    %16 = vector.load %arg3[%c0_7, %c0_8, %c0_9] : memref<1x4x128xf32, #tpu.memory_space<vmem>>, vector<1x4x128xf32>
    tpu.vector_store %arg3[%c0_7, %c0_8, %c0_9], %15 {strides = array<i32>} : memref<1x4x128xf32, #tpu.memory_space<vmem>>, vector<1x4x128xf32>,
    %c0_10 = arith.constant 0 : index
    %c0_11 = arith.constant 0 : index
    %c0_12 = arith.constant 0 : index
    %17 = vector.load %arg4[%c0_10, %c0_11, %c0_12] : memref<1x4x128xf32, #tpu.memory_space<vmem>>, vector<1x4x128xf32>
    %18 = vector.shape_cast %12 : vector<4x128xf32> to vector<1x4x128xf32>
    %19 = arith.addf %17, %18 : vector<1x4x128xf32>
    %c0_13 = arith.constant 0 : index
    %c0_14 = arith.constant 0 : index
    %c0_15 = arith.constant 0 : index
    %20 = vector.load %arg4[%c0_13, %c0_14, %c0_15] : memref<1x4x128xf32, #tpu.memory_space<vmem>>, vector<1x4x128xf32>
    tpu.vector_store %arg4[%c0_13, %c0_14, %c0_15], %19 {strides = array<i32>} : memref<1x4x128xf32, #tpu.memory_space<vmem>>, vector<1x4x128xf32>,
    return
  }
  func.func @transform_0(%arg0: i32, %arg1: i32) -> (i32, i32, i32) {
    %c0_i32 = arith.constant 0 : i32
    %0 = arith.addi %c0_i32, %arg0 : i32
    %c0_i32_0 = arith.constant 0 : i32
    %c0_i32_1 = arith.constant 0 : i32
    return %0, %c0_i32_0, %arg1 : i32, i32, i32
  }
  func.func @transform_1(%arg0: i32, %arg1: i32) -> (i32, i32, i32) {
    %c0_i32 = arith.constant 0 : i32
    %c0_i32_0 = arith.constant 0 : i32
    %c0_i32_1 = arith.constant 0 : i32
    return %arg0, %c0_i32, %c0_i32_0 : i32, i32, i32
  }
  func.func @transform_2(%arg0: i32, %arg1: i32) -> (i32, i32, i32) {
    %c0_i32 = arith.constant 0 : i32
    %c0_i32_0 = arith.constant 0 : i32
    %c0_i32_1 = arith.constant 0 : i32
    return %arg0, %c0_i32, %c0_i32_0 : i32, i32, i32
  }
}

</mosaic_0001>

<bundles_post_ra>
// kernel: tpu_custom_call.1
= control target key start
LH: loop header
LB: loop body
LE: loop exit
PB: predicated region body
PF: predicated region fallthrough
CT: control target
= control target key end

     0   :  { %8 = vsyncpa [#allocation3], 0  ;;  %s210_s0 = inlined_call_operand.hbm [shape: f32[2,4,256], index: 0, kind: input, shape index: {}]   ;;  %s211_s1 = inlined_call_operand.hbm [shape: f32[1,4,128], index: 1, kind: output, shape index: {0}]   ;;  %s212_s2 = inlined_call_operand.hbm [shape: f32[1,4,128], index: 2, kind: output, shape index: {1}]  }
   0x1   :  { %9 = vsyncpa [#allocation4], 0 }
   0x2   :  { %10 = vsyncpa [#allocation7], 0  ;;  %s172_s9 = smov [#allocation2]  }
   0x3   :  { %s16_s10 = sshll.u32 %s172_s9, 4  ;;  %s17_s10 = int_to_ptr.vmem [resolvable:$true] %s16_s10 }
   0x4   :  { %s114_s11 = scalar_lea.vmem %s17_s10, 256  ;;  %p119_p1 = scmp.lt.s32.totalorder %s17_s10, %s17_s10 }
   0x5   :  { %p115_p0 = scmp.ne.s32.totalorder %s17_s10, %s114_s11  ;;  %p120_p2 = scmp.lt.s32.totalorder %s114_s11, %s114_s11 }
   0x7   :  { %p121_p3 = por %p120_p2, %p119_p1 }
   0x9   :  { %p122_p4 = pnand %p121_p3, %p115_p0 }
   0xb   :  { %125 = shalt.err (!%p122_p4)
}
   0xc   :  { %s173_s12 = smov 128   ;;  %s174_s13 = smov 8  }
   0xd   :  { %22 = dma.hbm_to_vmem [thread:$0]  %s210_s0, 256, %s17_s10, [#allocation3], %s173_s12, %s173_s12, %s174_s13  }
   0xe   :  { %166 = dma.done.wait [#allocation3], 256  }
   0xf   :  { %167 = vsyncadd [#allocation3], 4294967040  ;;  %v175_v0 = vmov 0.0   ;;  %vm40_vm0 = vcmask 1043456   ;;  %v32_v1 = vld [vmem:[#allocation2] sm:$0xff]  ;;  %v33_v2 = vld [vmem:[#allocation2 + $0x8] sm:$0xff] }
  0x10   :  { %30 = vst [vmem:[#allocation5] sm:$0xf] %v175_v0  ;;  %31 = vst [vmem:[#allocation6] sm:$0xf] %v175_v0  ;;  %v36_v3 = vcombine.high %v32_v1, %v32_v1  ;;  %v37_v4 = vcombine.high %v33_v2, %v33_v2  ;;  %v41_v5 = vsel %vm40_vm0, %v32_v1, 0.0  ;;  %v42_v6 = vsel %vm40_vm0, %v33_v2, 0.0 }
  0x11   :  { %v43_v7 = vadd.f32 %v42_v6, %v41_v5  ;;  %v47_v8 = vmul.f32 %v32_v1, %v32_v1  ;;  %v48_v9 = vmul.f32 %v33_v2, %v33_v2  ;;  %s176_s0 = smov [#allocation5]   ;;  %s177_s17 = smov [#allocation6]  }
  0x12   :  { %v44_v10 = vsel %vm40_vm0, %v36_v3, 0.0  ;;  %v45_v11 = vsel %vm40_vm0, %v37_v4, 0.0  ;;  %s75_s16 = sshll.u32 %s176_s0, 4  ;;  %s85_s18 = sshll.u32 %s177_s17, 4  ;;  %s76_s16 = int_to_ptr.vmem [resolvable:$true] %s75_s16  ;;  %s86_s18 = int_to_ptr.vmem [resolvable:$true] %s85_s18 }
  0x13   :  { %v46_v12 = vadd.f32 %v45_v11, %v44_v10  ;;  %v51_v13 = vcombine.high %v47_v8, %v47_v8  ;;  %v52_v14 = vcombine.high %v48_v9, %v48_v9  ;;  %v55_v15 = vsel %vm40_vm0, %v47_v8, 0.0  ;;  %s126_s19 = scalar_lea.vmem %s76_s16, 64  ;;  %p131_p6 = scmp.lt.s32.totalorder %s76_s16, %s76_s16 }
  0x14   :  { %v56_v17 = vsel %vm40_vm0, %v48_v9, 0.0  ;;  %p127_p5 = scmp.ne.s32.totalorder %s76_s16, %s126_s19  ;;  %p132_p7 = scmp.lt.s32.totalorder %s126_s19, %s126_s19 }
  0x15   :  { %v61_v18 = vadd.f32 %v46_v12, %v43_v7  ;;  %v57_v19 = vadd.f32 %v56_v17, %v55_v15  ;;  %v58_v20 = vsel %vm40_vm0, %v51_v13, 0.0  ;;  %v59_v21 = vsel %vm40_vm0, %v52_v14, 0.0 }
  0x16   :  { %v60_v22 = vadd.f32 %v59_v21, %v58_v20  ;;  %p133_p8 = por %p132_p7, %p131_p6 }
  0x17   :  { %v63_v16 = vld [vmem:[#allocation5] sm:$0xf]  ;;  %v66_v24 = vld [vmem:[#allocation6] sm:$0xf] }
  0x18   :  { %v64_v23 = vadd.f32 %v63_v16, %v61_v18  ;;  %v62_v25 = vadd.f32 %v60_v22, %v57_v19  ;;  %p134_p9 = pnand %p133_p8, %p127_p5 }
  0x1a   :  { %65 = vst [vmem:[#allocation5] sm:$0xf] %v64_v23  ;;  %v67_v26 = vadd.f32 %v66_v24, %v62_v25 }
  0x1b   :  { %137 = shalt.err (!%p134_p9)
}
  0x1c   :  { %78 = dma.vmem_to_hbm [thread:$0]  %s76_s16, 64, %s211_s1, [#allocation4]   ;;  %68 = vst [vmem:[#allocation6] sm:$0xf] %v67_v26 }
  0x1d   :  { %s146_s22 = scalar_lea.vmem %s86_s18, 64  ;;  %p151_p11 = scmp.lt.s32.totalorder %s86_s18, %s86_s18 }
  0x1e   :  { %p147_p10 = scmp.ne.s32.totalorder %s86_s18, %s146_s22  ;;  %p152_p12 = scmp.lt.s32.totalorder %s146_s22, %s146_s22 }
  0x20   :  { %p153_p13 = por %p152_p12, %p151_p11 }
  0x22   :  { %p154_p0 = pnand %p153_p13, %p147_p10 }
  0x24   :  { %157 = shalt.err (!%p154_p0)
}
  0x25   :  { %88 = dma.vmem_to_hbm [thread:$0]  %s86_s18, 64, %s212_s2, [#allocation7]  }
  0x26   :  { %168 = dma.done.wait [#allocation4], 64  }
  0x27   :  { %169 = vsyncadd [#allocation4], 4294967232 }
  0x28   :  { %170 = dma.done.wait [#allocation7], 64  }
  0x29   :  { %171 = vsyncadd [#allocation7], 4294967232 }
  0x2a   :  { %95 = vsyncpa [#allocation3], 1 }
  0x2b   :  { %96 = vsyncpa [#allocation4], 1 }
  0x2c   :  { %97 = vsyncpa [#allocation7], 1 }

</bundles_post_ra>
